<compile_context>
chip_gen: v7x
topology: tpu7x:2x2x1
jax: 0.10.0
libtpu: 0.0.40
codegen_flags: <defaults>
</compile_context>

<pallas_src>
import functools

import jax
import jax.numpy as jnp
from jax.experimental import pallas as pl
from jax.experimental.pallas import tpu as pltpu

LANE = 128


def _ensemble_kernel(x_ref, w_ref, b_ref, o_ref):
    # x_ref: (tb, tk)  f32   activations tile (cast to bf16 here, on the VPU)
    # w_ref: (tk, Kp)  bf16  folded (averaged) weight tile
    # b_ref: (1,  Kp)  f32   folded bias (grid-invariant block)
    # o_ref: (tb, Kp)  f32   lane-dense output, VMEM-resident across k axis
    k = pl.program_id(1)

    @pl.when(k == 0)
    def _init():
        o_ref[...] = jnp.broadcast_to(b_ref[...], o_ref.shape)

    o_ref[...] += jnp.dot(
        x_ref[...].astype(jnp.bfloat16),
        w_ref[...],
        preferred_element_type=jnp.float32,
    )


def fold_ensemble_params(params):
    """Fold the three linear heads into one averaged, lane-padded head.

    Exact: the average of linear models sharing one input is itself linear.
    Returns (W_pad bf16 (F, Kp), b_pad f32 (1, Kp), true num_classes K).
    """
    (w1, b1), (w2, b2), (w3, b3) = params["m1"], params["m2"], params["m3"]
    feat, k = w1.shape
    third = jnp.float32(1.0 / 3.0)
    w_avg = (w1 + w2 + w3) * third          # (F, K) f32
    b_avg = (b1 + b2 + b3) * third          # (K,)  f32

    kp = ((k + LANE - 1) // LANE) * LANE    # pad class axis to 128 lanes
    w_pad = jnp.zeros((feat, kp), jnp.float32).at[:, :k].set(w_avg)
    b_pad = jnp.zeros((1, kp), jnp.float32).at[:, :k].set(b_avg)
    return w_pad.astype(jnp.bfloat16), b_pad, k


@functools.partial(
    jax.jit, static_argnames=("num_classes", "block_k", "block_b")
)
def ensemble_forward(x_nchw, w_pad, b_pad, *, num_classes,
                     block_k=2048, block_b=256):
    """x_nchw: (B, C, H, W) f32.  w_pad/b_pad from fold_ensemble_params."""
    bsz = x_nchw.shape[0]
    feat = x_nchw.shape[1] * x_nchw.shape[2] * x_nchw.shape[3]
    x_flat = x_nchw.reshape(bsz, feat)       # keep f32; bf16 cast in-kernel
    kp = w_pad.shape[1]

    # ---- reduction (feature) axis tiling ---------------------------------
    # Small F: single block -> single grid step along k (no pipeline bubbles).
    # Large F: fixed tk with >=0.5 MiB bf16 weight tiles; pad F with zeros
    # (exact for a matmul) so every block is full and VMEM stays bounded.
    single_block_limit = 8192                # bf16 weight tile <= 2 MiB @ Kp=128
    tk = feat if feat <= single_block_limit else block_k
    feat_p = ((feat + tk - 1) // tk) * tk
    if feat_p != feat:
        x_flat = jnp.pad(x_flat, ((0, 0), (0, feat_p - feat)))
        w_use = jnp.pad(w_pad, ((0, feat_p - feat), (0, 0)))
    else:
        w_use = w_pad

    # ---- batch axis tiling (leading "parallel" axis; megacore on v7x) -----
    if bsz <= block_b:
        tb, bsz_p = bsz, bsz
    else:
        tb = block_b
        bsz_p = ((bsz + tb - 1) // tb) * tb
        if bsz_p != bsz:
            x_flat = jnp.pad(x_flat, ((0, bsz_p - bsz), (0, 0)))

    grid = (bsz_p // tb, feat_p // tk)

    # ---- VMEM budget sized to the actual tiles (double-buffered) ----------
    tile_bytes = 2 * (tb * tk * 4 + tk * kp * 2 + kp * 4 + tb * kp * 4)
    vmem_limit = int(max(4 * 1024 * 1024, 2 * tile_bytes))

    out_pad = pl.pallas_call(
        _ensemble_kernel,
        out_shape=jax.ShapeDtypeStruct((bsz_p, kp), jnp.float32),
        grid_spec=pltpu.PrefetchScalarGridSpec(
            num_scalar_prefetch=0,
            grid=grid,
            in_specs=[
                pl.BlockSpec((tb, tk), lambda i, k: (i, k)),    # activations
                pl.BlockSpec((tk, kp), lambda i, k: (k, 0)),    # folded weight
                pl.BlockSpec((1, kp), lambda i, k: (0, 0)),     # folded bias
            ],
            out_specs=pl.BlockSpec((tb, kp), lambda i, k: (i, 0)),
        ),
        compiler_params=pltpu.CompilerParams(
            dimension_semantics=("parallel", "arbitrary"),
            vmem_limit_bytes=vmem_limit,
        ),
    )(x_flat, w_use, b_pad)

    return out_pad[:bsz, :num_classes]       # drop lane/batch padding


def init_params(key, in_features, num_classes):
    # TODO(synk): sub-model internals are opaque in the spec; each is
    # instantiated as a single Linear(in_features -> num_classes) head.
    keys = jax.random.split(key, 6)
    scale = 1.0 / jnp.sqrt(jnp.float32(in_features))

    def linear(kw, kb):
        w = jax.random.uniform(kw, (in_features, num_classes), jnp.float32,
                               minval=-scale, maxval=scale)
        b = jax.random.uniform(kb, (num_classes,), jnp.float32,
                               minval=-scale, maxval=scale)
        return w, b

    return {
        "m1": linear(keys[0], keys[1]),
        "m2": linear(keys[2], keys[3]),
        "m3": linear(keys[4], keys[5]),
    }


if __name__ == "__main__":
    key = jax.random.PRNGKey(0)
    k_x, k_p = jax.random.split(key)

    B, C, H, W = 2, 4, 16, 16        # NCHW, like PyTorch conv inputs
    num_classes = 10
    in_features = C * H * W

    x = jax.random.normal(k_x, (B, C, H, W), jnp.float32)
    params = init_params(k_p, in_features, num_classes)

    # Fold once (outside the hot path); run the Pallas kernel.
    w_pad, b_pad, K_true = fold_ensemble_params(params)
    out = ensemble_forward(x, w_pad, b_pad, num_classes=K_true)
    out = jax.block_until_ready(out)

    # --- correctness checks ---------------------------------------------
    x_flat = x.reshape(B, in_features)

    # (a) matched-precision reference: same bf16 inputs, f32 accumulate.
    ref_matched = (
        jnp.dot(x_flat.astype(jnp.bfloat16), w_pad,
                preferred_element_type=jnp.float32) + b_pad
    )[:, :num_classes]

    # (b) full-f32 ensemble-average semantics of the original module.
    ref_f32 = (x_flat @ params["m1"][0] + params["m1"][1]
               + x_flat @ params["m2"][0] + params["m2"][1]
               + x_flat @ params["m3"][0] + params["m3"][1]) / 3.0

    assert out.shape == (B, num_classes)
    assert jnp.allclose(out, ref_matched, atol=1e-3, rtol=1e-3), \
        "kernel vs matched-precision reference mismatch"
    assert jnp.allclose(out, ref_f32, atol=5e-2, rtol=5e-2), \
        "kernel vs f32 ensemble reference mismatch"

    print("KERNEL_OK")
</pallas_src>

<mosaic_0001>
module attributes {stable_mosaic.version = 11 : i64} {
  func.func @_ensemble_kernel(%arg0: i32, %arg1: i32, %arg2: memref<2x1024xf32, #tpu.memory_space<vmem>>, %arg3: memref<1024x128xbf16, #tpu.memory_space<vmem>>, %arg4: memref<1x128xf32, #tpu.memory_space<vmem>>, %arg5: memref<2x128xf32, #tpu.memory_space<vmem>>) attributes {dimension_semantics = [#tpu.dimension_semantics<parallel>, #tpu.dimension_semantics<arbitrary>], iteration_bounds = array<i64: 1, 1>, scalar_prefetch = 0 : i64, scratch_operands = 0 : i64, tpu.core_type = #tpu.core_type<tc>, window_params = [{transform_indices = @transform_0, window_bounds = array<i64: 2, 1024>}, {transform_indices = @transform_1, window_bounds = array<i64: 1024, 128>}, {pipeline_mode = #tpu.pipeline_mode<synchronous>, transform_indices = @transform_2, window_bounds = array<i64: 1, 128>}, {transform_indices = @transform_3, window_bounds = array<i64: 2, 128>}]} {
    %c0_i32 = arith.constant 0 : i32
    %0 = arith.cmpi eq, %arg1, %c0_i32 : i32
    %1 = arith.extui %0 : i1 to i32
    %c0_i32_0 = arith.constant 0 : i32
    %2 = arith.cmpi ne, %1, %c0_i32_0 : i32
    scf.if %2 {
      %c0_8 = arith.constant 0 : index
      %c0_9 = arith.constant 0 : index
      %10 = vector.load %arg4[%c0_8, %c0_9] : memref<1x128xf32, #tpu.memory_space<vmem>>, vector<1x128xf32>
      %11 = vector.shape_cast %10 : vector<1x128xf32> to vector<1x128xf32>
      %12 = vector.broadcast %11 : vector<1x128xf32> to vector<2x128xf32>
      %c0_10 = arith.constant 0 : index
      %c0_11 = arith.constant 0 : index
      %13 = vector.load %arg5[%c0_10, %c0_11] : memref<2x128xf32, #tpu.memory_space<vmem>>, vector<2x128xf32>
      tpu.vector_store %arg5[%c0_10, %c0_11], %12 {strides = array<i32>} : memref<2x128xf32, #tpu.memory_space<vmem>>, vector<2x128xf32>,
    } else {
    }
    %c0 = arith.constant 0 : index
    %c0_1 = arith.constant 0 : index
    %3 = vector.load %arg5[%c0, %c0_1] : memref<2x128xf32, #tpu.memory_space<vmem>>, vector<2x128xf32>
    %c0_2 = arith.constant 0 : index
    %c0_3 = arith.constant 0 : index
    %4 = vector.load %arg2[%c0_2, %c0_3] : memref<2x1024xf32, #tpu.memory_space<vmem>>, vector<2x1024xf32>
    %5 = arith.truncf %4 : vector<2x1024xf32> to vector<2x1024xbf16>
    %c0_4 = arith.constant 0 : index
    %c0_5 = arith.constant 0 : index
    %6 = vector.load %arg3[%c0_4, %c0_5] : memref<1024x128xbf16, #tpu.memory_space<vmem>>, vector<1024x128xbf16>
    %cst = arith.constant dense<0.000000e+00> : vector<2x128xf32>
    %7 = tpu.matmul %5, %6, %cst {dimension_numbers = #tpu.dot_dimension_numbers<[1], [0], [0], [1], [0, 0, 1, 1], [], []>} : vector<2x1024xbf16>, vector<1024x128xbf16>, vector<2x128xf32> -> vector<2x128xf32>
    %8 = arith.addf %3, %7 : vector<2x128xf32>
    %c0_6 = arith.constant 0 : index
    %c0_7 = arith.constant 0 : index
    %9 = vector.load %arg5[%c0_6, %c0_7] : memref<2x128xf32, #tpu.memory_space<vmem>>, vector<2x128xf32>
    tpu.vector_store %arg5[%c0_6, %c0_7], %8 {strides = array<i32>} : memref<2x128xf32, #tpu.memory_space<vmem>>, vector<2x128xf32>,
    return
  }
  func.func @transform_0(%arg0: i32, %arg1: i32) -> (i32, i32) {
    %c0_i32 = arith.constant 0 : i32
    return %arg0, %arg1 : i32, i32
  }
  func.func @transform_1(%arg0: i32, %arg1: i32) -> (i32, i32) {
    %c0_i32 = arith.constant 0 : i32
    %c0_i32_0 = arith.constant 0 : i32
    return %arg1, %c0_i32 : i32, i32
  }
  func.func @transform_2(%arg0: i32, %arg1: i32) -> (i32, i32) {
    %c0_i32 = arith.constant 0 : i32
    %c0_i32_0 = arith.constant 0 : i32
    %c0_i32_1 = arith.constant 0 : i32
    return %c0_i32, %c0_i32_0 : i32, i32
  }
  func.func @transform_3(%arg0: i32, %arg1: i32) -> (i32, i32) {
    %c0_i32 = arith.constant 0 : i32
    %c0_i32_0 = arith.constant 0 : i32
    return %arg0, %c0_i32 : i32, i32
  }
}

</mosaic_0001>

<bundles_post_ra>
// kernel: ensemble_forward.1
= control target key start
LH: loop header
LB: loop body
LE: loop exit
PB: predicated region body
PF: predicated region fallthrough
CT: control target
= control target key end

     0   :  { %8 = vsyncpa [#allocation3], 0  ;;  %s1122_s0 = inlined_call_operand.vmem [shape: f32[2,1024], index: 0, kind: input, shape index: {}]   ;;  %s1123_s1 = inlined_call_operand.hbm [shape: bf16[1024,128], index: 1, kind: input, shape index: {}]   ;;  %s1124_s2 = inlined_call_operand.vmem [shape: f32[1,128], index: 2, kind: input, shape index: {}]   ;;  %s1125_s3 = inlined_call_operand.hbm [shape: f32[2,128], index: 3, kind: output, shape index: {}]  }
   0x1   :  { %9 = vsyncpa [#allocation4], 0  ;;  %s1058_s12 = smov [#allocation2]   ;;  %s1010_s16 = scalar_lea.hbm %s1123_s1, 8192 }
   0x2   :  { %s17_s13 = sshll.u32 %s1058_s12, 4  ;;  %p1011_p0 = scmp.ne.s32.totalorder %s1123_s1, %s1010_s16  ;;  %s18_s13 = int_to_ptr.vmem [resolvable:$true] %s17_s13 }
   0x3   :  { %p1014_p1 = scmp.lt.u32.totalorder %s1010_s16, %s1123_s1 }
   0x5   :  { %p1016_p2 = pnand %p1014_p1, %p1011_p0 }
   0x7   :  { %1019 = shalt.err (!%p1016_p2)
}
   0x8   :  { %s1020_s21 = scalar_lea.vmem %s18_s13, 8192  ;;  %p1025_p4 = scmp.lt.s32.totalorder %s18_s13, %s18_s13 }
   0x9   :  { %p1021_p3 = scmp.ne.s32.totalorder %s18_s13, %s1020_s21  ;;  %p1026_p5 = scmp.lt.s32.totalorder %s1020_s21, %s1020_s21 }
   0xb   :  { %p1027_p6 = por %p1026_p5, %p1025_p4 }
   0xd   :  { %p1028_p7 = pnand %p1027_p6, %p1021_p3 }
   0xf   :  { %1031 = shalt.err (!%p1028_p7)
}
  0x10   :  { %s1059_s22 = smov 64   ;;  %s1060_s23 = smov 4  }
  0x11   :  { %23 = dma.hbm_to_vmem [thread:$0]  %s1123_s1, 8192, %s18_s13, [#allocation3], %s1059_s22, %s1059_s22, %s1060_s23  }
  0x12   :  { %1054 = dma.done.wait [#allocation3], 8192  }
  0x13   :  { %1055 = vsyncadd [#allocation3], 4294959104  ;;  %v944_v0 = vld [vmem:[#allocation2 + $0x40] sm:$0xff]   ;;  %v948_v4 = vld [vmem:[#allocation2 + $0x48] sm:$0xff]   ;;  %v1061_v22 = vmov 1983009808   ;;  %v51_v24 = vlaneseq }
  0x14   :  { %v945_v1 = vld [vmem:[#allocation2 + $0xc0] sm:$0xff]   ;;  %851 = vmatprep.subr.bf16.mxu0 %v944_v0  ;;  %v949_v5 = vld [vmem:[#allocation2 + $0xc8] sm:$0xff]   ;;  %v952_v8 = vld [vmem:[#allocation2 + $0x50] sm:$0xff]   ;;  %v49_v23 = vunpack.c.l.s4 %v1061_v22 }
  0x15   :  { %v946_v2 = vld [vmem:[#allocation2] sm:$0xff]   ;;  %873 = vmatprep.subr.bf16.mxu1 %v945_v1  ;;  %v950_v6 = vld [vmem:[#allocation2 + $0x8] sm:$0xff]   ;;  %v953_v9 = vld [vmem:[#allocation2 + $0xd0] sm:$0xff]   ;;  %v52_v30 = vshrl.u32 %v51_v24, 7 }
  0x16   :  { %v947_v3 = vld [vmem:[#allocation2 + $0x80] sm:$0xff]   ;;  %852 = vmatpush3.bf16.msra.mxu0 %v946_v2  ;;  %v951_v7 = vld [vmem:[#allocation2 + $0x88] sm:$0xff]   ;;  %v954_v10 = vld [vmem:[#allocation2 + $0x10] sm:$0xff]   ;;  %v50_v29 = vunpack.c.0.s8 %v49_v23 }
  0x17   :  { %874 = vmatpush3.bf16.msra.mxu1 %v947_v3  ;;  %853 = vmatprep.subr.bf16.mxu0 %v948_v4  ;;  %v955_v11 = vld [vmem:[#allocation2 + $0x90] sm:$0xff]   ;;  %v956_v12 = vld [vmem:[#allocation2 + $0x58] sm:$0xff]   ;;  %v960_v16 = vld [vmem:[#allocation2 + $0x60] sm:$0xff]  }
  0x18   :  { %875 = vmatprep.subr.bf16.mxu1 %v949_v5  ;;  %v957_v13 = vld [vmem:[#allocation2 + $0xd8] sm:$0xff]   ;;  %v961_v17 = vld [vmem:[#allocation2 + $0xe0] sm:$0xff]   ;;  %v964_v20 = vld [vmem:[#allocation2 + $0x68] sm:$0xff]   ;;  %v1095_v35 = vsub.s32 %v50_v29, %v52_v30 }
  0x19   :  { %v958_v14 = vld [vmem:[#allocation2 + $0x18] sm:$0xff]   ;;  %v962_v18 = vld [vmem:[#allocation2 + $0x20] sm:$0xff]   ;;  %v965_v21 = vld [vmem:[#allocation2 + $0xe8] sm:$0xff]  }
  0x1a   :  { %854 = vmatpush3.bf16.msra.mxu0 %v950_v6  ;;  %v959_v15 = vld [vmem:[#allocation2 + $0x98] sm:$0xff]   ;;  %v963_v19 = vld [vmem:[#allocation2 + $0xa0] sm:$0xff]   ;;  %v966_v25 = vld [vmem:[#allocation2 + $0x28] sm:$0xff]  }
  0x1b   :  { %876 = vmatpush3.bf16.msra.mxu1 %v951_v7  ;;  %855 = vmatprep.subr.bf16.mxu0 %v952_v8  ;;  %v967_v26 = vld [vmem:[#allocation2 + $0xa8] sm:$0xff]   ;;  %v968_v27 = vld [vmem:[#allocation2 + $0x70] sm:$0xff]   ;;  %v972_v33 = vld [vmem:[#allocation2 + $0x78] sm:$0xff]  }
  0x1c   :  { %877 = vmatprep.subr.bf16.mxu1 %v953_v9  ;;  %v969_v28 = vld [vmem:[#allocation2 + $0xf0] sm:$0xff]   ;;  %v973_v34 = vld [vmem:[#allocation2 + $0xf8] sm:$0xff]   ;;  %v43_v38 = vld [vmem:[%s1122_s0] sm:$0xff] }
  0x1d   :  { %v970_v31 = vld [vmem:[#allocation2 + $0x30] sm:$0xff]   ;;  %v974_v36 = vld [vmem:[#allocation2 + $0x38] sm:$0xff]   ;;  %v54_v39 = vrot.slane %v43_v38, %v1095_v35  ;;  %v47_v40 = vcombine.high %v43_v38, %v43_v38  ;;  %v977_v41 = vld [vmem:[#allocation2 + $0x140] sm:$0xff]  }
  0x1e   :  { %856 = vmatpush3.bf16.msra.mxu0 %v954_v10  ;;  %v971_v32 = vld [vmem:[#allocation2 + $0xb0] sm:$0xff]   ;;  %v975_v37 = vld [vmem:[#allocation2 + $0xb8] sm:$0xff]   ;;  %v978_v42 = vld [vmem:[#allocation2 + $0x1c0] sm:$0xff]  }
  0x1f   :  { %878 = vmatpush3.bf16.msra.mxu1 %v955_v11  ;;  %857 = vmatprep.subr.bf16.mxu0 %v956_v12  ;;  %v62_v43 = vcombine.high %v54_v39, %v54_v39  ;;  %v61_v44 = vrot.slane %v47_v40, %v1095_v35  ;;  %v89_v45 = vpack.c.bf16 %v54_v39, %v54_v39  ;;  %v979_v48 = vld [vmem:[#allocation2 + $0x100] sm:$0xff]   ;;  %v981_v50 = vld [vmem:[#allocation2 + $0x148] sm:$0xff]   ;;  %v985_v55 = vld [vmem:[#allocation2 + $0x150] sm:$0xff]  }
  0x20   :  { %879 = vmatprep.subr.bf16.mxu1 %v957_v13  ;;  %v980_v52 = vld [vmem:[#allocation2 + $0x180] sm:$0xff]   ;;  %v982_v53 = vld [vmem:[#allocation2 + $0x1c8] sm:$0xff]   ;;  %v986_v57 = vld [vmem:[#allocation2 + $0x1d0] sm:$0xff]  }
  0x21   :  { %v90_v46 = vpack.c.bf16 %v62_v43, %v62_v43  ;;  %v63_v47 = vcombine.high %v61_v44, %v61_v44  ;;  %v91_v49 = vpack.c.bf16 %v61_v44, %v61_v44  ;;  %v983_v54 = vld [vmem:[#allocation2 + $0x108] sm:$0xff]   ;;  %v987_v58 = vld [vmem:[#allocation2 + $0x110] sm:$0xff]   ;;  %v989_v59 = vld [vmem:[#allocation2 + $0x158] sm:$0xff]  }
  0x22   :  { %858 = vmatpush3.bf16.msra.mxu0 %v958_v14  ;;  %v984_v56 = vld [vmem:[#allocation2 + $0x188] sm:$0xff]   ;;  %v988_v60 = vld [vmem:[#allocation2 + $0x190] sm:$0xff]   ;;  %v990_v61 = vld [vmem:[#allocation2 + $0x1d8] sm:$0xff]  }
  0x23   :  { %880 = vmatpush3.bf16.msra.mxu1 %v959_v15  ;;  %859 = vmatprep.subr.bf16.mxu0 %v960_v16  ;;  %v92_v51 = vpack.c.bf16 %v63_v47, %v63_v47  ;;  %v991_v62 = vld [vmem:[#allocation2 + $0x118] sm:$0xff]   ;;  %v993_v63 = vld [vmem:[#allocation2 + $0x160] sm:$0xff]   ;;  %v997_v3 = vld [vmem:[#allocation2 + $0x168] sm:$0xff]  }
  0x24   :  { %881 = vmatprep.subr.bf16.mxu1 %v961_v17  ;;  %641 = vmatprep.mubr.bf16.mxu0 %v90_v46  ;;  %v992_v0 = vld [vmem:[#allocation2 + $0x198] sm:$0xff]   ;;  %v994_v1 = vld [vmem:[#allocation2 + $0x1e0] sm:$0xff]   ;;  %v998_v5 = vld [vmem:[#allocation2 + $0x1e8] sm:$0xff]  }
  0x25   :  { %681 = vmatprep.mubr.bf16.mxu1 %v92_v51  ;;  %v995_v2 = vld [vmem:[#allocation2 + $0x120] sm:$0xff]   ;;  %v999_v6 = vld [vmem:[#allocation2 + $0x128] sm:$0xff]   ;;  %v1001_v7 = vld [vmem:[#allocation2 + $0x170] sm:$0xff]  }
  0x26   :  { %860 = vmatpush3.bf16.msra.mxu0 %v962_v18  ;;  %v996_v4 = vld [vmem:[#allocation2 + $0x1a0] sm:$0xff]   ;;  %v1000_v8 = vld [vmem:[#allocation2 + $0x1a8] sm:$0xff]   ;;  %v1002_v9 = vld [vmem:[#allocation2 + $0x1f0] sm:$0xff]  }
  0x27   :  { %882 = vmatpush3.bf16.msra.mxu1 %v963_v19  ;;  %861 = vmatprep.subr.bf16.mxu0 %v964_v20  ;;  %v1003_v10 = vld [vmem:[#allocation2 + $0x130] sm:$0xff]   ;;  %v1005_v11 = vld [vmem:[#allocation2 + $0x178] sm:$0xff]   ;;  %v44_v14 = vld [vmem:[%s1122_s0 + $0x8] sm:$0xff] }
  0x28   :  { %883 = vmatprep.subr.bf16.mxu1 %v965_v21  ;;  %v1004_v12 = vld [vmem:[#allocation2 + $0x1b0] sm:$0xff]   ;;  %v1006_v13 = vld [vmem:[#allocation2 + $0x1f8] sm:$0xff]   ;;  %v71_v16 = vrot.slane %v44_v14, %v1095_v35  ;;  %v64_v17 = vcombine.high %v44_v14, %v44_v14 }
  0x29   :  { %v1007_v15 = vld [vmem:[#allocation2 + $0x138] sm:$0xff]  }
  0x2a   :  { %862 = vmatpush3.bf16.msra.mxu0 %v966_v25  ;;  %v1008_v18 = vld [vmem:[#allocation2 + $0x1b8] sm:$0xff]   ;;  %v79_v19 = vcombine.high %v71_v16, %v71_v16  ;;  %v78_v20 = vrot.slane %v64_v17, %v1095_v35  ;;  %v93_v21 = vpack.c.bf16 %v71_v16, %v71_v16 }
  0x2b   :  { %884 = vmatpush3.bf16.msra.mxu1 %v967_v26  ;;  %863 = vmatprep.subr.bf16.mxu0 %v968_v27  ;;  %v786_v26 = vld [vmem:[%s1124_s2] ss:$0 sm:$0xff]  ;;  %s1062_s2 = smov [#allocation5]  }
  0x2c   :  { %885 = vmatprep.subr.bf16.mxu1 %v969_v28  ;;  %v94_v22 = vpack.c.bf16 %v79_v19, %v79_v19  ;;  %v80_v23 = vcombine.high %v78_v20, %v78_v20  ;;  %v95_v24 = vpack.c.bf16 %v78_v20, %v78_v20  ;;  %41 = vst [vmem:[#allocation5] sm:$0x3] %v786_v26  ;;  %s777_s30 = sshll.u32 %s1062_s2, 4  ;;  %s778_s30 = int_to_ptr.vmem [resolvable:$true] %s777_s30 }
  0x2d   :  { %s1032_s4 = scalar_lea.vmem %s778_s30, 32  ;;  %p1037_p9 = scmp.lt.s32.totalorder %s778_s30, %s778_s30 }
  0x2e   :  { %864 = vmatpush3.bf16.msra.mxu0 %v970_v31  ;;  %v96_v25 = vpack.c.bf16 %v80_v23, %v80_v23  ;;  %p1033_p8 = scmp.ne.s32.totalorder %s778_s30, %s1032_s4  ;;  %p1038_p10 = scmp.lt.s32.totalorder %s1032_s4, %s1032_s4 }
  0x2f   :  { %886 = vmatpush3.bf16.msra.mxu1 %v971_v32  ;;  %865 = vmatprep.subr.bf16.mxu0 %v972_v33 }
  0x30   :  { %887 = vmatprep.subr.bf16.mxu1 %v973_v34  ;;  %p1039_p11 = por %p1038_p10, %p1037_p9 }
  0x32   :  { %866 = vmatpush3.bf16.msra.mxu0 %v974_v36  ;;  %p1040_p12 = pnand %p1039_p11, %p1033_p8 }
  0x33   :  { %888 = vmatpush3.bf16.msra.mxu1 %v975_v37  ;;  %895 = vmatprep.subr.bf16.mxu0 %v977_v41 }
  0x34   :  { %917 = vmatprep.subr.bf16.mxu1 %v978_v42 }
  0x35   :  { %642 = vmatmul.mubr.bf16.vlgmr.msra.gmra.mrb[0].mxu0 %v89_v45 }
  0x36   :  { %896 = vmatpush3.bf16.msra.mxu0 %v979_v48  ;;  %682 = vmatmul.mubr.bf16.vlgmr.msra.gmra.mrb[0].mxu1 %v91_v49  ;;  %v42_v48 = vld [vmem:[#allocation5] sm:$0x3] }
  0x37   :  { %897 = vmatprep.subr.bf16.mxu0 %v981_v50  ;;  %918 = vmatpush3.bf16.msra.mxu1 %v980_v52 }
  0x38   :  { %919 = vmatprep.subr.bf16.mxu1 %v982_v53  ;;  %721 = vmatprep.mubr.bf16.mxu0 %v94_v22 }
  0x39   :  { %761 = vmatprep.mubr.bf16.mxu1 %v96_v25 }
  0x3a   :  { %898 = vmatpush3.bf16.msra.mxu0 %v983_v54 }
  0x3b   :  { %899 = vmatprep.subr.bf16.mxu0 %v985_v55  ;;  %920 = vmatpush3.bf16.msra.mxu1 %v984_v56 }
  0x3c   :  { %921 = vmatprep.subr.bf16.mxu1 %v986_v57 }
  0x3e   :  { %900 = vmatpush3.bf16.msra.mxu0 %v987_v58 }
  0x3f   :  { %901 = vmatprep.subr.bf16.mxu0 %v989_v59  ;;  %922 = vmatpush3.bf16.msra.mxu1 %v988_v60 }
  0x40   :  { %923 = vmatprep.subr.bf16.mxu1 %v990_v61 }
  0x42   :  { %902 = vmatpush3.bf16.msra.mxu0 %v991_v62 }
  0x43   :  { %903 = vmatprep.subr.bf16.mxu0 %v993_v63  ;;  %924 = vmatpush3.bf16.msra.mxu1 %v992_v0 }
  0x44   :  { %925 = vmatprep.subr.bf16.mxu1 %v994_v1 }
  0x46   :  { %904 = vmatpush3.bf16.msra.mxu0 %v995_v2 }
  0x47   :  { %905 = vmatprep.subr.bf16.mxu0 %v997_v3  ;;  %926 = vmatpush3.bf16.msra.mxu1 %v996_v4 }
  0x48   :  { %927 = vmatprep.subr.bf16.mxu1 %v998_v5 }
  0x4a   :  { %906 = vmatpush3.bf16.msra.mxu0 %v999_v6 }
  0x4b   :  { %907 = vmatprep.subr.bf16.mxu0 %v1001_v7  ;;  %928 = vmatpush3.bf16.msra.mxu1 %v1000_v8 }
  0x4c   :  { %929 = vmatprep.subr.bf16.mxu1 %v1002_v9 }
  0x4e   :  { %908 = vmatpush3.bf16.msra.mxu0 %v1003_v10 }
  0x4f   :  { %909 = vmatprep.subr.bf16.mxu0 %v1005_v11  ;;  %930 = vmatpush3.bf16.msra.mxu1 %v1004_v12 }
  0x50   :  { %931 = vmatprep.subr.bf16.mxu1 %v1006_v13 }
  0x52   :  { %910 = vmatpush3.bf16.msra.mxu0 %v1007_v15 }
  0x53   :  { %932 = vmatpush3.bf16.msra.mxu1 %v1008_v18 }
  0x55   :  { %722 = vmatmul.mubr.bf16.vlgmr.msra.gmra.mrb[4].mxu0 %v93_v21 }
  0x56   :  { %762 = vmatmul.mubr.bf16.vlgmr.msra.gmra.mrb[4].mxu1 %v95_v24 }
 0x108   :  { %v867_v27 = vpop.f32.mrb[0].mxu0 }
 0x109   :  { %v868_v28 = vpop.f32.mrb[1].mxu0  ;;  %v889_v29 = vpop.f32.mrb[0].mxu1 }
 0x10a   :  { %v869_v30 = vadd.f32 %v868_v28, %v867_v27  ;;  %v870_v31 = vpop.f32.mrb[2].mxu0  ;;  %v890_v32 = vpop.f32.mrb[1].mxu1 }
 0x10b   :  { %v871_v33 = vpop.f32.mrb[3].mxu0  ;;  %v891_v34 = vadd.f32 %v890_v32, %v889_v29  ;;  %v892_v35 = vpop.f32.mrb[2].mxu1 }
 0x10c   :  { %v893_v36 = vpop.f32.mrb[3].mxu1 }
 0x10d   :  { %v684_v37 = vadd.f32 %v891_v34, %v869_v30 }
 0x128   :  { %v911_v38 = vpop.f32.mrb[4].mxu0 }
 0x129   :  { %v912_v39 = vpop.f32.mrb[5].mxu0  ;;  %v933_v40 = vpop.f32.mrb[4].mxu1 }
 0x12a   :  { %v913_v41 = vadd.f32 %v912_v39, %v911_v38  ;;  %v914_v42 = vpop.f32.mrb[6].mxu0  ;;  %v934_v43 = vpop.f32.mrb[5].mxu1 }
 0x12b   :  { %v915_v44 = vpop.f32.mrb[7].mxu0  ;;  %v935_v46 = vadd.f32 %v934_v43, %v933_v40  ;;  %v936_v47 = vpop.f32.mrb[6].mxu1 }
 0x12c   :  { %v724_v45 = vadd.f32 %v913_v41, %v684_v37  ;;  %v937_v49 = vpop.f32.mrb[7].mxu1 }
 0x12e   :  { %v764_v50 = vadd.f32 %v935_v46, %v724_v45 }
 0x130   :  { %v769_v51 = vadd.f32 %v764_v50, %v42_v48 }
 0x132   :  { %770 = vst [vmem:[#allocation5] sm:$0x3] %v769_v51 }
 0x133   :  { %1043 = shalt.err (!%p1040_p12)
}
 0x134   :  { %s1044_s7 = scalar_lea.hbm %s1125_s3, 32 }
 0x135   :  { %p1045_p13 = scmp.ne.s32.totalorder %s1125_s3, %s1044_s7  ;;  %p1048_p0 = scmp.lt.u32.totalorder %s1044_s7, %s1125_s3 }
 0x137   :  { %p1050_p1 = pnand %p1048_p0, %p1045_p13 }
 0x139   :  { %1053 = shalt.err (!%p1050_p1)
}
 0x13a   :  { %780 = dma.vmem_to_hbm [thread:$0]  %s778_s30, 32, %s1125_s3, [#allocation4]  }
 0x13b   :  { %1056 = dma.done.wait [#allocation4], 32  }
 0x13c   :  { %1057 = vsyncadd [#allocation4], 4294967264 }
 0x13d   :  { %784 = vsyncpa [#allocation3], 1 }
 0x13e   :  { %785 = vsyncpa [#allocation4], 1 }

</bundles_post_ra>
